<compile_context>
chip_gen: v6e
topology: v6e:2x2x1
jax: 0.10.0
libtpu: 0.0.40
codegen_flags: <defaults>
</compile_context>

<pallas_src>
import functools

import numpy as np
import jax
import jax.numpy as jnp
from jax.experimental import pallas as pl
from jax.experimental.pallas import tpu as pltpu


def _round_up(v, m):
    return ((v + m - 1) // m) * m


def _pick_tile(size, align, max_tile):
    """Pad `size` to a multiple of `align`; pick the largest tile <= max_tile
    that is a multiple of `align` and divides the padded size (no extra pad)."""
    padded = _round_up(size, align)
    tile = align
    for cand in range(min(max_tile, padded), align - 1, -align):
        if padded % cand == 0:
            tile = cand
            break
    return padded, tile


def _dti_kmeans_kernel(x_ref, p_ref, xx_ref, pp_ref, dist_ref, acc_ref, *, inv_d):
    # Grid: (i over B tiles, j over K tiles, k over D tiles [reduction]).
    # x_ref: [tm, tk], p_ref: [tn, tk], xx_ref: [tm, 1], pp_ref: [1, tn]
    # dist_ref: [tm, tn], acc_ref: VMEM f32 [tm, tn]
    k = pl.program_id(2)

    @pl.when(k == 0)
    def _():
        acc_ref[...] = jnp.zeros_like(acc_ref)

    # MXU contraction of the current D tile: acc += x . p^T  (f32 accumulate).
    acc_ref[...] += jax.lax.dot_general(
        x_ref[...], p_ref[...], (((1,), (1,)), ((), ())),
        preferred_element_type=jnp.float32)

    @pl.when(k == pl.num_programs(2) - 1)
    def _():
        # dist = (||x||^2 + ||p||^2 - 2 x.p) / D; clamp tiny negatives from
        # catastrophic cancellation when x ~= prototype (true MSE is >= 0).
        dist = (xx_ref[...] + pp_ref[...] - 2.0 * acc_ref[...]) * inv_d
        dist_ref[...] = jnp.maximum(dist, 0.0)


def dti_kmeans_forward(x, prototype_params, *, mxu_dtype=jnp.float32):
    """x: [B, C, H, W], prototype_params: [K, C, H, W].

    Returns (dist_min_mean: scalar, distances: [B, K]) matching
    DTIKmeans.forward with an identity transformer and no loss weights.
    """
    B = x.shape[0]
    K = prototype_params.shape[0]
    D = int(np.prod(x.shape[1:]))

    x_flat = x.reshape(B, D).astype(jnp.float32)
    p_flat = prototype_params.reshape(K, D).astype(jnp.float32)

    # Hoisted row norms (negligible XLA work; avoids full-D XLU reductions and
    # the transpose inside the kernel, and stays correct under D tiling).
    xx = jnp.sum(x_flat * x_flat, axis=1, keepdims=True)        # [B, 1]
    pp = jnp.sum(p_flat * p_flat, axis=1, keepdims=True).T      # [1, K]

    # Tile sizes: sublane-aligned B tile; lane-dense (128-multiple) K/D tiles.
    # Worst case (tm=512, tn=512, tk=1024, f32, double-buffered) ~11 MiB VMEM.
    Bp, tm = _pick_tile(B, 8, 512)
    Kp, tn = _pick_tile(K, 128, 512)
    Dp, tk = _pick_tile(D, 128, 1024)

    # Zero-pad: padded rows/cols contribute 0 to all sums and are sliced off.
    if (Bp, Dp) == (B, D) and mxu_dtype == x_flat.dtype:
        x_pad = x_flat
    else:
        x_pad = jnp.zeros((Bp, Dp), mxu_dtype).at[:B, :D].set(
            x_flat.astype(mxu_dtype))
    if (Kp, Dp) == (K, D) and mxu_dtype == p_flat.dtype:
        p_pad = p_flat
    else:
        p_pad = jnp.zeros((Kp, Dp), mxu_dtype).at[:K, :D].set(
            p_flat.astype(mxu_dtype))
    xx_pad = xx if Bp == B else jnp.zeros((Bp, 1), jnp.float32).at[:B, :].set(xx)
    pp_pad = pp if Kp == K else jnp.zeros((1, Kp), jnp.float32).at[:, :K].set(pp)

    grid = (Bp // tm, Kp // tn, Dp // tk)

    dist_pad = pl.pallas_call(
        functools.partial(_dti_kmeans_kernel, inv_d=1.0 / D),
        grid_spec=pltpu.PrefetchScalarGridSpec(
            num_scalar_prefetch=0,
            grid=grid,
            in_specs=[
                pl.BlockSpec((tm, tk), lambda i, j, k: (i, k)),   # x tile
                pl.BlockSpec((tn, tk), lambda i, j, k: (j, k)),   # proto tile
                pl.BlockSpec((tm, 1), lambda i, j, k: (i, 0)),    # ||x||^2
                pl.BlockSpec((1, tn), lambda i, j, k: (0, j)),    # ||p||^2
            ],
            out_specs=pl.BlockSpec((tm, tn), lambda i, j, k: (i, j)),
            scratch_shapes=[pltpu.VMEM((tm, tn), jnp.float32)],
        ),
        out_shape=jax.ShapeDtypeStruct((Bp, Kp), jnp.float32),
        compiler_params=pltpu.CompilerParams(
            dimension_semantics=("parallel", "parallel", "arbitrary"),
            vmem_limit_bytes=32 * 1024 * 1024,
        ),
    )(x_pad, p_pad, xx_pad, pp_pad)

    distances = dist_pad[:B, :K]
    # Trivial [B, K] reduction done in XLA (correct regardless of K tiling).
    loss = jnp.mean(jnp.min(distances, axis=1))
    return loss, distances


if __name__ == "__main__":
    # Small deterministic shapes consistent with the module:
    # batch=2, color_channels=3, img_size=(16,16), n_prototypes=10.
    B, C, H, W = 2, 3, 16, 16
    K = 10

    key = jax.random.PRNGKey(0)
    kx, kp = jax.random.split(key)
    x = jax.random.uniform(kx, (B, C, H, W), dtype=jnp.float32)
    # Deterministic synthetic prototype_params (stand-in for 'sample' data init).
    prototype_params = jax.random.uniform(kp, (K, C, H, W), dtype=jnp.float32)

    loss, distances = jax.jit(dti_kmeans_forward)(x, prototype_params)
    jax.block_until_ready((loss, distances))

    # Pure-JAX reference of the same forward semantics.
    diff = x[:, None] - prototype_params[None]                  # [B, K, C, H, W]
    ref_dist = jnp.mean(diff.reshape(B, K, -1) ** 2, axis=2)    # [B, K]
    ref_loss = jnp.mean(jnp.min(ref_dist, axis=1))

    assert distances.shape == (B, K)
    assert np.allclose(np.asarray(distances), np.asarray(ref_dist),
                       rtol=1e-4, atol=1e-5)
    assert np.allclose(np.asarray(loss), np.asarray(ref_loss),
                       rtol=1e-4, atol=1e-5)

    print("KERNEL_OK")
</pallas_src>

<mosaic_0001>
module attributes {stable_mosaic.version = 11 : i64} {
  func.func @_dti_kmeans_kernel(%arg0: i32, %arg1: i32, %arg2: i32, %arg3: memref<8x768xf32, #tpu.memory_space<vmem>>, %arg4: memref<128x768xf32, #tpu.memory_space<vmem>>, %arg5: memref<8x1xf32, #tpu.memory_space<vmem>>, %arg6: memref<1x128xf32, #tpu.memory_space<vmem>>, %arg7: memref<8x128xf32, #tpu.memory_space<vmem>>, %arg8: memref<8x128xf32, #tpu.memory_space<vmem>>) attributes {dimension_semantics = [#tpu.dimension_semantics<parallel>, #tpu.dimension_semantics<parallel>, #tpu.dimension_semantics<arbitrary>], iteration_bounds = array<i64: 1, 1, 1>, scalar_prefetch = 0 : i64, scratch_operands = 1 : i64, tpu.core_type = #tpu.core_type<tc>, window_params = [{transform_indices = @transform_0, window_bounds = array<i64: 8, 768>}, {transform_indices = @transform_1, window_bounds = array<i64: 128, 768>}, {transform_indices = @transform_2, window_bounds = array<i64: 8, 1>}, {transform_indices = @transform_3, window_bounds = array<i64: 1, 128>}, {transform_indices = @transform_4, window_bounds = array<i64: 8, 128>}]} {
    %c0_i32 = arith.constant 0 : i32
    %0 = arith.cmpi eq, %arg2, %c0_i32 : i32
    %1 = arith.extui %0 : i1 to i32
    %c0_i32_0 = arith.constant 0 : i32
    %2 = arith.cmpi ne, %1, %c0_i32_0 : i32
    scf.if %2 {
      %cst_10 = arith.constant 0.000000e+00 : f32
      %12 = vector.broadcast %cst_10 : f32 to vector<8x128xf32>
      %c0_11 = arith.constant 0 : index
      %c0_12 = arith.constant 0 : index
      %13 = vector.load %arg8[%c0_11, %c0_12] : memref<8x128xf32, #tpu.memory_space<vmem>>, vector<8x128xf32>
      tpu.vector_store %arg8[%c0_11, %c0_12], %12 {strides = array<i32>} : memref<8x128xf32, #tpu.memory_space<vmem>>, vector<8x128xf32>,
    } else {
    }
    %c0 = arith.constant 0 : index
    %c0_1 = arith.constant 0 : index
    %3 = vector.load %arg8[%c0, %c0_1] : memref<8x128xf32, #tpu.memory_space<vmem>>, vector<8x128xf32>
    %c0_2 = arith.constant 0 : index
    %c0_3 = arith.constant 0 : index
    %4 = vector.load %arg3[%c0_2, %c0_3] : memref<8x768xf32, #tpu.memory_space<vmem>>, vector<8x768xf32>
    %c0_4 = arith.constant 0 : index
    %c0_5 = arith.constant 0 : index
    %5 = vector.load %arg4[%c0_4, %c0_5] : memref<128x768xf32, #tpu.memory_space<vmem>>, vector<128x768xf32>
    %cst = arith.constant dense<0.000000e+00> : vector<8x128xf32>
    %6 = tpu.matmul %4, %5, %cst {dimension_numbers = #tpu.dot_dimension_numbers<[1], [1], [0], [0], [0, 0, 1, 0], [], []>} : vector<8x768xf32>, vector<128x768xf32>, vector<8x128xf32> -> vector<8x128xf32>
    %7 = arith.addf %3, %6 : vector<8x128xf32>
    %c0_6 = arith.constant 0 : index
    %c0_7 = arith.constant 0 : index
    %8 = vector.load %arg8[%c0_6, %c0_7] : memref<8x128xf32, #tpu.memory_space<vmem>>, vector<8x128xf32>
    tpu.vector_store %arg8[%c0_6, %c0_7], %7 {strides = array<i32>} : memref<8x128xf32, #tpu.memory_space<vmem>>, vector<8x128xf32>,
    %c0_i32_8 = arith.constant 0 : i32
    %9 = arith.cmpi eq, %arg2, %c0_i32_8 : i32
    %10 = arith.extui %9 : i1 to i32
    %c0_i32_9 = arith.constant 0 : i32
    %11 = arith.cmpi ne, %10, %c0_i32_9 : i32
    scf.if %11 {
      %c0_10 = arith.constant 0 : index
      %c0_11 = arith.constant 0 : index
      %12 = vector.load %arg5[%c0_10, %c0_11] : memref<8x1xf32, #tpu.memory_space<vmem>>, vector<8x1xf32>
      %c0_12 = arith.constant 0 : index
      %c0_13 = arith.constant 0 : index
      %13 = vector.load %arg6[%c0_12, %c0_13] : memref<1x128xf32, #tpu.memory_space<vmem>>, vector<1x128xf32>
      %14 = vector.broadcast %12 : vector<8x1xf32> to vector<8x128xf32>
      %15 = vector.broadcast %13 : vector<1x128xf32> to vector<8x128xf32>
      %16 = arith.addf %14, %15 : vector<8x128xf32>
      %c0_14 = arith.constant 0 : index
      %c0_15 = arith.constant 0 : index
      %17 = vector.load %arg8[%c0_14, %c0_15] : memref<8x128xf32, #tpu.memory_space<vmem>>, vector<8x128xf32>
      %cst_16 = arith.constant 2.000000e+00 : f32
      %18 = vector.broadcast %cst_16 : f32 to vector<8x128xf32>
      %19 = arith.mulf %18, %17 : vector<8x128xf32>
      %20 = arith.subf %16, %19 : vector<8x128xf32>
      %cst_17 = arith.constant 0.00130208337 : f32
      %21 = vector.broadcast %cst_17 : f32 to vector<8x128xf32>
      %22 = arith.mulf %20, %21 : vector<8x128xf32>
      %cst_18 = arith.constant 0.000000e+00 : f32
      %23 = vector.broadcast %cst_18 : f32 to vector<8x128xf32>
      %24 = arith.maximumf %22, %23 : vector<8x128xf32>
      %c0_19 = arith.constant 0 : index
      %c0_20 = arith.constant 0 : index
      %25 = vector.load %arg7[%c0_19, %c0_20] : memref<8x128xf32, #tpu.memory_space<vmem>>, vector<8x128xf32>
      tpu.vector_store %arg7[%c0_19, %c0_20], %24 {strides = array<i32>} : memref<8x128xf32, #tpu.memory_space<vmem>>, vector<8x128xf32>,
    } else {
    }
    return
  }
  func.func @transform_0(%arg0: i32, %arg1: i32, %arg2: i32) -> (i32, i32) {
    %c0_i32 = arith.constant 0 : i32
    return %arg0, %arg2 : i32, i32
  }
  func.func @transform_1(%arg0: i32, %arg1: i32, %arg2: i32) -> (i32, i32) {
    %c0_i32 = arith.constant 0 : i32
    return %arg1, %arg2 : i32, i32
  }
  func.func @transform_2(%arg0: i32, %arg1: i32, %arg2: i32) -> (i32, i32) {
    %c0_i32 = arith.constant 0 : i32
    %c0_i32_0 = arith.constant 0 : i32
    return %arg0, %c0_i32 : i32, i32
  }
  func.func @transform_3(%arg0: i32, %arg1: i32, %arg2: i32) -> (i32, i32) {
    %c0_i32 = arith.constant 0 : i32
    %c0_i32_0 = arith.constant 0 : i32
    return %c0_i32, %arg1 : i32, i32
  }
  func.func @transform_4(%arg0: i32, %arg1: i32, %arg2: i32) -> (i32, i32) {
    %c0_i32 = arith.constant 0 : i32
    return %arg0, %arg1 : i32, i32
  }
}

</mosaic_0001>

<bundles_post_ra>
// kernel: dti_kmeans_forward.1
= control target key start
LH: loop header
LB: loop body
LE: loop exit
PB: predicated region body
PF: predicated region fallthrough
CT: control target
= control target key end

     0   :  { %v367_v10 = vmov 0   ;;  %s708_s1 = inlined_call_operand.vmem [shape: f32[128,768], index: 1, kind: input, shape index: {}]   ;;  %s709_s0 = inlined_call_operand.vmem [shape: f32[8,768], index: 0, kind: input, shape index: {}]   ;;  %s710_s2 = inlined_call_operand.vmem [shape: f32[8,1], index: 2, kind: input, shape index: {}]   ;;  %s711_s3 = inlined_call_operand.vmem [shape: f32[1,128], index: 3, kind: input, shape index: {}]   ;;  %s712_s4 = inlined_call_operand.vmem [shape: f32[8,128], index: 4, kind: output, shape index: {}]  }
   0x1   :  { %v120_v0 = vld [vmem:[%s708_s1 + $0x2d8] sm:$0xff]  ;;  %v119_v1 = vld [vmem:[%s708_s1 + $0x2d0] sm:$0xff]  ;;  %v122_v2 = vld [vmem:[%s708_s1 + $0x2e8] sm:$0xff]  ;;  %366 = vset.pattern.permute.xlu0 %v367_v10 }
   0x2   :  { %125 = vmatprep.subr.mxu0 %v120_v0  ;;  %195 = vmatprep.subr.mxu1 %v122_v2  ;;  %v121_v3 = vld [vmem:[%s708_s1 + $0x2e0] sm:$0xff]  ;;  %v114_v4 = vld [vmem:[%s708_s1 + $0x2a8] sm:$0xff]  ;;  %v116_v5 = vld [vmem:[%s708_s1 + $0x2b8] sm:$0xff] }
   0x3   :  { %126 = vmatpush1.xpose.msra.mxu0 %v119_v1  ;;  %196 = vmatpush1.xpose.msra.mxu1 %v121_v3  ;;  %v113_v6 = vld [vmem:[%s708_s1 + $0x2a0] sm:$0xff]  ;;  %v115_v7 = vld [vmem:[%s708_s1 + $0x2b0] sm:$0xff]  ;;  %v108_v8 = vld [vmem:[%s708_s1 + $0x278] sm:$0xff] }
   0x4   :  { %127 = vmatprep.subr.mxu0 %v114_v4  ;;  %197 = vmatprep.subr.mxu1 %v116_v5  ;;  %v110_v9 = vld [vmem:[%s708_s1 + $0x288] sm:$0xff]  ;;  %v107_v11 = vld [vmem:[%s708_s1 + $0x270] sm:$0xff]  ;;  %v109_v12 = vld [vmem:[%s708_s1 + $0x280] sm:$0xff] }
   0x5   :  { %v102_v13 = vld [vmem:[%s708_s1 + $0x248] sm:$0xff]  ;;  %v104_v14 = vld [vmem:[%s708_s1 + $0x258] sm:$0xff]  ;;  %v101_v15 = vld [vmem:[%s708_s1 + $0x240] sm:$0xff] }
   0x6   :  { %v103_v16 = vld [vmem:[%s708_s1 + $0x250] sm:$0xff]  ;;  %v96_v17 = vld [vmem:[%s708_s1 + $0x218] sm:$0xff]  ;;  %v98_v18 = vld [vmem:[%s708_s1 + $0x228] sm:$0xff] }
   0x7   :  { %128 = vmatpush1.xpose.msra.mxu0 %v113_v6  ;;  %198 = vmatpush1.xpose.msra.mxu1 %v115_v7  ;;  %v95_v19 = vld [vmem:[%s708_s1 + $0x210] sm:$0xff]  ;;  %v97_v20 = vld [vmem:[%s708_s1 + $0x220] sm:$0xff]  ;;  %v90_v21 = vld [vmem:[%s708_s1 + $0x1e8] sm:$0xff] }
   0x8   :  { %129 = vmatprep.subr.mxu0 %v108_v8  ;;  %199 = vmatprep.subr.mxu1 %v110_v9  ;;  %v92_v22 = vld [vmem:[%s708_s1 + $0x1f8] sm:$0xff]  ;;  %v89_v23 = vld [vmem:[%s708_s1 + $0x1e0] sm:$0xff]  ;;  %v91_v24 = vld [vmem:[%s708_s1 + $0x1f0] sm:$0xff] }
   0x9   :  { %v84_v25 = vld [vmem:[%s708_s1 + $0x1b8] sm:$0xff]  ;;  %v86_v26 = vld [vmem:[%s708_s1 + $0x1c8] sm:$0xff]  ;;  %v83_v29 = vld [vmem:[%s708_s1 + $0x1b0] sm:$0xff] }
   0xa   :  { %v24_v27 = vld [vmem:[%s709_s0 + $0x8] sm:$0xff]  ;;  %v26_v28 = vld [vmem:[%s709_s0 + $0x18] sm:$0xff]  ;;  %v85_v30 = vld [vmem:[%s708_s1 + $0x1c0] sm:$0xff] }
   0xb   :  { %130 = vmatpush1.xpose.msra.mxu0 %v107_v11  ;;  %200 = vmatpush1.xpose.msra.mxu1 %v109_v12  ;;  %v78_v31 = vld [vmem:[%s708_s1 + $0x188] sm:$0xff]  ;;  %v80_v32 = vld [vmem:[%s708_s1 + $0x198] sm:$0xff]  ;;  %v77_v33 = vld [vmem:[%s708_s1 + $0x180] sm:$0xff] }
   0xc   :  { %131 = vmatprep.subr.mxu0 %v102_v13  ;;  %201 = vmatprep.subr.mxu1 %v104_v14  ;;  %v79_v34 = vld [vmem:[%s708_s1 + $0x190] sm:$0xff]  ;;  %v72_v35 = vld [vmem:[%s708_s1 + $0x158] sm:$0xff]  ;;  %v74_v36 = vld [vmem:[%s708_s1 + $0x168] sm:$0xff] }
   0xd   :  { %189 = vmatprep.mubr.f32.mxu0 %v24_v27  ;;  %259 = vmatprep.mubr.f32.mxu1 %v26_v28  ;;  %v71_v37 = vld [vmem:[%s708_s1 + $0x150] sm:$0xff]  ;;  %v73_v38 = vld [vmem:[%s708_s1 + $0x160] sm:$0xff]  ;;  %v66_v39 = vld [vmem:[%s708_s1 + $0x128] sm:$0xff] }
   0xe   :  { %v68_v40 = vld [vmem:[%s708_s1 + $0x138] sm:$0xff]  ;;  %v340_v41 = vld [vmem:[%s710_s2] sm:$0xff]  ;;  %v67_v43 = vld [vmem:[%s708_s1 + $0x130] sm:$0xff] }
   0xf   :  { %132 = vmatpush1.xpose.msra.mxu0 %v101_v15  ;;  %202 = vmatpush1.xpose.msra.mxu1 %v103_v16  ;;  %v65_v42 = vld [vmem:[%s708_s1 + $0x120] sm:$0xff]  ;;  %v60_v44 = vld [vmem:[%s708_s1 + $0xf8] sm:$0xff]  ;;  %v62_v45 = vld [vmem:[%s708_s1 + $0x108] sm:$0xff] }
  0x10   :  { %133 = vmatprep.subr.mxu0 %v96_v17  ;;  %203 = vmatprep.subr.mxu1 %v98_v18  ;;  %v59_v46 = vld [vmem:[%s708_s1 + $0xf0] sm:$0xff]  ;;  %v61_v47 = vld [vmem:[%s708_s1 + $0x100] sm:$0xff]  ;;  %v54_v48 = vld [vmem:[%s708_s1 + $0xc8] sm:$0xff] }
  0x11   :  { %344 = vperm.xlu0 %366, %v340_v41   ;;  %v56_v49 = vld [vmem:[%s708_s1 + $0xd8] sm:$0xff]  ;;  %v53_v50 = vld [vmem:[%s708_s1 + $0xc0] sm:$0xff]  ;;  %v55_v51 = vld [vmem:[%s708_s1 + $0xd0] sm:$0xff] }
  0x12   :  { %v48_v52 = vld [vmem:[%s708_s1 + $0x98] sm:$0xff]  ;;  %v50_v53 = vld [vmem:[%s708_s1 + $0xa8] sm:$0xff]  ;;  %v47_v54 = vld [vmem:[%s708_s1 + $0x90] sm:$0xff] }
  0x13   :  { %134 = vmatpush1.xpose.msra.mxu0 %v95_v19  ;;  %204 = vmatpush1.xpose.msra.mxu1 %v97_v20  ;;  %v49_v55 = vld [vmem:[%s708_s1 + $0xa0] sm:$0xff]  ;;  %v42_v56 = vld [vmem:[%s708_s1 + $0x68] sm:$0xff]  ;;  %v44_v57 = vld [vmem:[%s708_s1 + $0x78] sm:$0xff] }
  0x14   :  { %135 = vmatprep.subr.mxu0 %v90_v21  ;;  %205 = vmatprep.subr.mxu1 %v92_v22  ;;  %v41_v58 = vld [vmem:[%s708_s1 + $0x60] sm:$0xff]  ;;  %v43_v59 = vld [vmem:[%s708_s1 + $0x70] sm:$0xff]  ;;  %v36_v60 = vld [vmem:[%s708_s1 + $0x38] sm:$0xff] }
  0x15   :  { %v38_v61 = vld [vmem:[%s708_s1 + $0x48] sm:$0xff]  ;;  %v35_v62 = vld [vmem:[%s708_s1 + $0x30] sm:$0xff]  ;;  %v37_v63 = vld [vmem:[%s708_s1 + $0x40] sm:$0xff] }
  0x16   :  { %v30_v0 = vld [vmem:[%s708_s1 + $0x8] sm:$0xff]  ;;  %v32_v1 = vld [vmem:[%s708_s1 + $0x18] sm:$0xff]  ;;  %v29_v2 = vld [vmem:[%s708_s1] sm:$0xff] }
  0x17   :  { %136 = vmatpush1.xpose.msra.mxu0 %v89_v23  ;;  %206 = vmatpush1.xpose.msra.mxu1 %v91_v24  ;;  %v31_v3 = vld [vmem:[%s708_s1 + $0x10] sm:$0xff]  ;;  %v124_v4 = vld [vmem:[%s708_s1 + $0x2f8] sm:$0xff]  ;;  %v23_v5 = vld [vmem:[%s709_s0] sm:$0xff] }
  0x18   :  { %137 = vmatprep.subr.mxu0 %v84_v25  ;;  %207 = vmatprep.subr.mxu1 %v86_v26  ;;  %v25_v6 = vld [vmem:[%s709_s0 + $0x10] sm:$0xff]  ;;  %v28_v8 = vld [vmem:[%s709_s0 + $0x28] sm:$0xff]  ;;  %v117_v10 = vld [vmem:[%s708_s1 + $0x2c0] sm:$0xff] }
  0x19   :  { %v123_v7 = vld [vmem:[%s708_s1 + $0x2f0] sm:$0xff]  ;;  %v118_v9 = vld [vmem:[%s708_s1 + $0x2c8] sm:$0xff]  ;;  %v112_v11 = vld [vmem:[%s708_s1 + $0x298] sm:$0xff] }
  0x1a   :  { %v111_v12 = vld [vmem:[%s708_s1 + $0x290] sm:$0xff]  ;;  %v106_v13 = vld [vmem:[%s708_s1 + $0x268] sm:$0xff]  ;;  %v105_v14 = vld [vmem:[%s708_s1 + $0x260] sm:$0xff] }
  0x1b   :  { %138 = vmatpush1.xpose.msra.mxu0 %v83_v29  ;;  %208 = vmatpush1.xpose.msra.mxu1 %v85_v30  ;;  %v100_v15 = vld [vmem:[%s708_s1 + $0x238] sm:$0xff]  ;;  %v99_v16 = vld [vmem:[%s708_s1 + $0x230] sm:$0xff]  ;;  %v94_v17 = vld [vmem:[%s708_s1 + $0x208] sm:$0xff] }
  0x1c   :  { %139 = vmatprep.subr.mxu0 %v78_v31  ;;  %209 = vmatprep.subr.mxu1 %v80_v32  ;;  %v93_v18 = vld [vmem:[%s708_s1 + $0x200] sm:$0xff]  ;;  %v88_v19 = vld [vmem:[%s708_s1 + $0x1d8] sm:$0xff]  ;;  %v87_v20 = vld [vmem:[%s708_s1 + $0x1d0] sm:$0xff] }
  0x1d   :  { %v82_v21 = vld [vmem:[%s708_s1 + $0x1a8] sm:$0xff]  ;;  %v81_v22 = vld [vmem:[%s708_s1 + $0x1a0] sm:$0xff]  ;;  %v76_v23 = vld [vmem:[%s708_s1 + $0x178] sm:$0xff] }
  0x1e   :  { %v75_v24 = vld [vmem:[%s708_s1 + $0x170] sm:$0xff]  ;;  %v70_v25 = vld [vmem:[%s708_s1 + $0x148] sm:$0xff]  ;;  %v69_v26 = vld [vmem:[%s708_s1 + $0x140] sm:$0xff] }
  0x1f   :  { %140 = vmatpush1.xpose.msra.mxu0 %v77_v33  ;;  %210 = vmatpush1.xpose.msra.mxu1 %v79_v34  ;;  %v64_v27 = vld [vmem:[%s708_s1 + $0x118] sm:$0xff]  ;;  %v63_v28 = vld [vmem:[%s708_s1 + $0x110] sm:$0xff]  ;;  %v58_v29 = vld [vmem:[%s708_s1 + $0xe8] sm:$0xff] }
  0x20   :  { %141 = vmatprep.subr.mxu0 %v72_v35  ;;  %211 = vmatprep.subr.mxu1 %v74_v36  ;;  %v57_v30 = vld [vmem:[%s708_s1 + $0xe0] sm:$0xff]  ;;  %v52_v31 = vld [vmem:[%s708_s1 + $0xb8] sm:$0xff]  ;;  %v51_v32 = vld [vmem:[%s708_s1 + $0xb0] sm:$0xff] }
  0x21   :  { %v46_v33 = vld [vmem:[%s708_s1 + $0x88] sm:$0xff]  ;;  %v45_v34 = vld [vmem:[%s708_s1 + $0x80] sm:$0xff]  ;;  %v40_v35 = vld [vmem:[%s708_s1 + $0x58] sm:$0xff] }
  0x22   :  { %v39_v36 = vld [vmem:[%s708_s1 + $0x50] sm:$0xff] }
  0x23   :  { %142 = vmatpush1.xpose.msra.mxu0 %v71_v37  ;;  %212 = vmatpush1.xpose.msra.mxu1 %v73_v38  ;;  %v34_v37 = vld [vmem:[%s708_s1 + $0x28] sm:$0xff]  ;;  %v33_v38 = vld [vmem:[%s708_s1 + $0x20] sm:$0xff] }
  0x24   :  { %143 = vmatprep.subr.mxu0 %v66_v39  ;;  %213 = vmatprep.subr.mxu1 %v68_v40  ;;  %v27_v39 = vld [vmem:[%s709_s0 + $0x20] sm:$0xff] }
  0x27   :  { %144 = vmatpush1.xpose.msra.mxu0 %v65_v42  ;;  %214 = vmatpush1.xpose.msra.mxu1 %v67_v43 }
  0x28   :  { %145 = vmatprep.subr.mxu0 %v60_v44  ;;  %215 = vmatprep.subr.mxu1 %v62_v45  ;;  %v364_v44 = vld [vmem:[%s711_s3] ss:$0 sm:$0xff] }
  0x2b   :  { %146 = vmatpush1.xpose.msra.mxu0 %v59_v46  ;;  %216 = vmatpush1.xpose.msra.mxu1 %v61_v47 }
  0x2c   :  { %147 = vmatprep.subr.mxu0 %v54_v48  ;;  %217 = vmatprep.subr.mxu1 %v56_v49 }
  0x2f   :  { %148 = vmatpush1.xpose.msra.mxu0 %v53_v50  ;;  %218 = vmatpush1.xpose.msra.mxu1 %v55_v51 }
  0x30   :  { %149 = vmatprep.subr.mxu0 %v48_v52  ;;  %219 = vmatprep.subr.mxu1 %v50_v53 }
  0x33   :  { %150 = vmatpush1.xpose.msra.mxu0 %v47_v54  ;;  %220 = vmatpush1.xpose.msra.mxu1 %v49_v55 }
  0x34   :  { %151 = vmatprep.subr.mxu0 %v42_v56  ;;  %221 = vmatprep.subr.mxu1 %v44_v57 }
  0x37   :  { %152 = vmatpush1.xpose.msra.mxu0 %v41_v58  ;;  %222 = vmatpush1.xpose.msra.mxu1 %v43_v59 }
  0x38   :  { %153 = vmatprep.subr.mxu0 %v36_v60  ;;  %223 = vmatprep.subr.mxu1 %v38_v61 }
  0x3b   :  { %154 = vmatpush1.xpose.msra.mxu0 %v35_v62  ;;  %224 = vmatpush1.xpose.msra.mxu1 %v37_v63 }
  0x3c   :  { %155 = vmatprep.subr.mxu0 %v30_v0  ;;  %225 = vmatprep.subr.mxu1 %v32_v1 }
  0x3f   :  { %156 = vmatpush1.xpose.msra.mxu0 %v29_v2  ;;  %226 = vmatpush1.xpose.msra.mxu1 %v31_v3 }
  0x40   :  { %265 = vmatprep.subr.mxu0 %v124_v4 }
  0x42   :  { %190 = vmatmul.mubr.f32.vlgmr.msra.gmra.mxu0 %v23_v5  ;;  %260 = vmatmul.mubr.f32.vlgmr.msra.gmra.mxu1 %v25_v6 }
  0x43   :  { %266 = vmatpush1.xpose.msra.mxu0 %v123_v7  ;;  %329 = vmatprep.mubr.f32.mxu0 %v28_v8 }
  0x44   :  { %267 = vmatprep.subr.mxu0 %v118_v9 }
  0x47   :  { %268 = vmatpush1.xpose.msra.mxu0 %v117_v10 }
  0x48   :  { %269 = vmatprep.subr.mxu0 %v112_v11 }
  0x4b   :  { %270 = vmatpush1.xpose.msra.mxu0 %v111_v12 }
  0x4c   :  { %271 = vmatprep.subr.mxu0 %v106_v13 }
  0x4f   :  { %272 = vmatpush1.xpose.msra.mxu0 %v105_v14 }
  0x50   :  { %273 = vmatprep.subr.mxu0 %v100_v15 }
  0x53   :  { %274 = vmatpush1.xpose.msra.mxu0 %v99_v16 }
  0x54   :  { %275 = vmatprep.subr.mxu0 %v94_v17 }
  0x57   :  { %276 = vmatpush1.xpose.msra.mxu0 %v93_v18 }
  0x58   :  { %277 = vmatprep.subr.mxu0 %v88_v19 }
  0x5b   :  { %278 = vmatpush1.xpose.msra.mxu0 %v87_v20 }
  0x5c   :  { %279 = vmatprep.subr.mxu0 %v82_v21 }
  0x5f   :  { %280 = vmatpush1.xpose.msra.mxu0 %v81_v22 }
  0x60   :  { %281 = vmatprep.subr.mxu0 %v76_v23 }
  0x63   :  { %282 = vmatpush1.xpose.msra.mxu0 %v75_v24 }
  0x64   :  { %283 = vmatprep.subr.mxu0 %v70_v25 }
  0x67   :  { %284 = vmatpush1.xpose.msra.mxu0 %v69_v26 }
  0x68   :  { %285 = vmatprep.subr.mxu0 %v64_v27 }
  0x6b   :  { %286 = vmatpush1.xpose.msra.mxu0 %v63_v28 }
  0x6c   :  { %287 = vmatprep.subr.mxu0 %v58_v29 }
  0x6f   :  { %288 = vmatpush1.xpose.msra.mxu0 %v57_v30 }
  0x70   :  { %289 = vmatprep.subr.mxu0 %v52_v31 }
  0x73   :  { %290 = vmatpush1.xpose.msra.mxu0 %v51_v32 }
  0x74   :  { %291 = vmatprep.subr.mxu0 %v46_v33 }
  0x77   :  { %292 = vmatpush1.xpose.msra.mxu0 %v45_v34 }
  0x78   :  { %293 = vmatprep.subr.mxu0 %v40_v35 }
  0x7b   :  { %294 = vmatpush1.xpose.msra.mxu0 %v39_v36 }
  0x7c   :  { %295 = vmatprep.subr.mxu0 %v34_v37 }
  0x7f   :  { %296 = vmatpush1.xpose.msra.mxu0 %v33_v38 }
  0x82   :  { %330 = vmatmul.mubr.f32.vlgmr.msra.gmra.mxu0 %v27_v39 }
  0x8c   :  { %v345_v45 = vpop.permute.xlu0 %344 }
  0x8d   :  { %v353_v49 = vadd.f32 %v364_v44, %v345_v45 }
 0x102   :  { %v191_v40 = vpop.f32.mrf.mxu0  ;;  %v261_v41 = vpop.f32.mrf.mxu1 }
 0x103   :  { %v262_v46 = vadd.f32 %v261_v41, %v191_v40 }
 0x104   :  { %v193_v42 = vpop.f32.mrf.mxu0  ;;  %v263_v43 = vpop.f32.mrf.mxu1 }
 0x142   :  { %v331_v47 = vpop.f32.mrf.mxu0 }
 0x143   :  { %v332_v48 = vadd.f32 %v331_v47, %v262_v46 }
 0x144   :  { %v333_v50 = vpop.f32.mrf.mxu0 }
 0x145   :  { %v355_v51 = vmul.f32 2.0, %v332_v48 }
 0x147   :  { %v356_v52 = vsub.f32 %v353_v49, %v355_v51 }
 0x149   :  { %v357_v53 = vmul.f32 0.0013020834, %v356_v52 }
 0x14b   :  { %v358_v54 = vmax.f32 %v357_v53, 0.0 }
 0x14d   :  { %359 = vst [vmem:[%s712_s4] sm:$0xff] %v358_v54 }

</bundles_post_ra>
